<compile_context>
chip_gen: v6e
topology: v6e:2x2x1
jax: 0.10.0
libtpu: 0.0.40
codegen_flags: <defaults>
</compile_context>

<pallas_src>
import jax
import jax.numpy as jnp
from jax import lax
from jax.experimental import pallas as pl
from jax.experimental.pallas import tpu as pltpu


def channel_sampler_kernel(x_ref, w_ref, b_ref, u_ref, g_ref, xout_ref, alpha_ref):
    TB, SH = x_ref.shape
    S = u_ref.shape[1]
    H = SH // S

    xb = x_ref[...]                                               # (TB, S*H) lane-dense

    # v = tanh(x @ W + b) for every channel at once: block-diagonal W slab,
    # single lane-dense MXU pass over the whole batch tile.
    v = jnp.tanh(
        jnp.dot(xb, w_ref[...], preferred_element_type=jnp.float32) + b_ref[...]
    )                                                             # (TB, S*A)

    # vu[b, s] = v[b, s*A:(s+1)*A] . u_omega  (block-structured u matrix, MXU).
    vu = jnp.dot(v, u_ref[...], preferred_element_type=jnp.float32)   # (TB, S)

    # alphas = exp(vu) / sum_s exp(vu)  -- module does NOT max-subtract; exact
    # divide keeps near-tie argmax behaviour identical to the PyTorch module.
    exps = jnp.exp(vu)
    denom = jnp.sum(exps, axis=-1, keepdims=True)
    alphas = exps / denom                                         # (TB, S)

    # gumbel_softmax(alphas, tau, hard=True): forward value is the one-hot of
    # argmax(alphas + gumbel_noise); tau / the soft path only affect gradients.
    scores = alphas + g_ref[...]                                  # (TB, S)
    mx = jnp.max(scores, axis=-1, keepdims=True)
    s_iota = lax.broadcasted_iota(jnp.int32, scores.shape, 1)
    idx = jnp.min(jnp.where(scores == mx, s_iota, jnp.int32(S)),
                  axis=-1, keepdims=True)                         # first argmax, (TB,1)
    onehot = (s_iota == idx).astype(jnp.float32)                  # (TB, S)
    # TODO(synk): straight-through residual (y_hard - y_soft.detach() + y_soft)
    # only matters for gradients; forward value equals the one-hot used here.

    # out[b, :] = x[b, idx[b], :] -- unrolled select-accumulate over the small
    # channel axis; stays in 2-D (TB, H) vregs (no (TB, S, H) f32 temporary).
    acc = jnp.where(idx == 0, xb[:, 0:H], 0.0)
    for s in range(1, S):
        acc = acc + jnp.where(idx == s, xb[:, s * H:(s + 1) * H], 0.0)

    xout_ref[...] = acc
    alpha_ref[...] = onehot


def _round_up(v, m):
    return ((v + m - 1) // m) * m


def _pick_batch_tile(B, S, H, A, vmem_cap):
    """VMEM-sized, megacore-aware batch tile (multiple of 8; no padding needed)."""
    if B <= 8:
        return B                               # single tiny step
    budget = vmem_cap // 2                     # leave half for compiler slack
    # resident f32 bytes per batch row: double-buffered x block + loaded copy,
    # v intermediates, double-buffered outputs + gumbel.
    per_row = 4 * (3 * S * H + 2 * S * A + 2 * H + 4 * S)
    tb_cap = max(8, min((budget // per_row) // 8 * 8, 2048))
    # At least 2 grid steps so ("parallel",) shards across v7x's two TensorCores.
    return min(tb_cap, max(8, _round_up((B + 1) // 2, 8)))


def channel_sampler(x, w_omega, b_omega, u_omega, gumbel, *, batch_tile=None):
    """x: [B, S, H] float32. Returns (x_out [B, H], alphas_hard [B, S])."""
    B, S, H = x.shape
    A = w_omega.shape[-1]

    x = jnp.asarray(x, jnp.float32)
    w = jnp.asarray(w_omega, jnp.float32)
    b = jnp.asarray(b_omega, jnp.float32).reshape(-1)
    u = jnp.asarray(u_omega, jnp.float32).reshape(-1)
    g = jnp.asarray(gumbel, jnp.float32)

    # Lane-dense x: collapse (S, H) into the trailing axis (free for a
    # contiguous array) so streaming loads use full 128-lane vregs.
    x2 = x.reshape(B, S * H)

    # Block-structured parameter slabs (tiny, resident in VMEM):
    #   w_big[s*H+h, t*A+a] = (s==t) * W[h, a]
    #   b_big[0,     t*A+a] = b[a]
    #   u_mat[t*A+a, s]     = (s==t) * u[a]
    eye_s = jnp.eye(S, dtype=jnp.float32)
    w_big = jnp.einsum('st,ha->shta', eye_s, w).reshape(S * H, S * A)
    b_big = jnp.tile(b, S).reshape(1, S * A)
    u_mat = jnp.einsum('ts,a->tas', eye_s, u).reshape(S * A, S)

    # Per-generation VMEM capacity (v7x: 64 MiB/TC, v5e/v6e: 128 MiB).
    try:
        vmem_cap = int(pltpu.get_tpu_info().vmem_capacity_bytes)
    except Exception:
        vmem_cap = 64 << 20                    # conservative (v7x) fallback

    TB = batch_tile if batch_tile is not None else _pick_batch_tile(B, S, H, A, vmem_cap)
    # Ragged tail handled by Pallas partial blocks -- no jnp.pad HBM retraffic.
    n_steps = pl.cdiv(B, TB)

    # Raise the scoped-VMEM limit past the 16/32 MiB defaults, with headroom,
    # but never above physical capacity.
    est_vmem = 4 * (3 * TB * S * H + 2 * TB * S * A + TB * (2 * H + 4 * S)
                    + S * H * S * A + S * A * (S + 1))
    vmem_limit = int(min(max(2 * est_vmem, 32 << 20), vmem_cap * 7 // 8))

    cost = pl.CostEstimate(
        flops=2 * B * S * H * S * A + 2 * B * S * A * S + B * S * H,
        transcendentals=B * S * (A + 1),
        bytes_accessed=4 * (B * S * H + B * (H + 2 * S)
                            + S * H * S * A + S * A * (S + 1)),
    )

    out_shapes = (
        jax.ShapeDtypeStruct((B, H), jnp.float32),
        jax.ShapeDtypeStruct((B, S), jnp.float32),
    )
    xout, alphas = pl.pallas_call(
        channel_sampler_kernel,
        out_shape=out_shapes,
        grid=(n_steps,),
        in_specs=[
            # If profiling shows exposed DMA on v5e, add
            # pipeline_mode=pl.Buffered(3) to this x spec.
            pl.BlockSpec((TB, S * H), lambda i: (i, 0)),       # x (lane-dense stream)
            pl.BlockSpec((S * H, S * A), lambda i: (0, 0)),    # W slab (resident)
            pl.BlockSpec((1, S * A), lambda i: (0, 0)),        # b slab (resident)
            pl.BlockSpec((S * A, S), lambda i: (0, 0)),        # u slab (resident)
            pl.BlockSpec((TB, S), lambda i: (i, 0)),           # gumbel noise
        ],
        out_specs=(
            pl.BlockSpec((TB, H), lambda i: (i, 0)),
            pl.BlockSpec((TB, S), lambda i: (i, 0)),
        ),
        compiler_params=pltpu.CompilerParams(
            dimension_semantics=("parallel",),
            vmem_limit_bytes=vmem_limit),
        cost_estimate=cost,
    )(x2, w_big, b_big, u_mat, g)
    return xout, alphas


def channel_sampler_ref(x, w_omega, b_omega, u_omega, gumbel):
    """Pure-JAX reference mirroring the PyTorch forward."""
    B, S, H = x.shape
    v = jnp.tanh(x.reshape(B * S, H) @ w_omega + b_omega[None, :])
    vu = v @ u_omega
    exps = jnp.exp(vu).reshape(B, S)
    alphas = exps / jnp.sum(exps, axis=1, keepdims=True)
    idx = jnp.argmax(alphas + gumbel, axis=1)
    onehot = jax.nn.one_hot(idx, S, dtype=jnp.float32)
    out = jnp.sum(onehot[:, :, None] * x, axis=1)   # exact selection (no MXU rounding)
    return out, onehot


def _check(B, S, H, A, seed):
    key = jax.random.PRNGKey(seed)
    k_x, k_w, k_b, k_u, k_g = jax.random.split(key, 5)
    x = jax.random.normal(k_x, (B, S, H), dtype=jnp.float32)
    w_omega = 0.1 * jax.random.normal(k_w, (H, A), dtype=jnp.float32)
    b_omega = 0.1 * jax.random.normal(k_b, (A,), dtype=jnp.float32)
    u_omega = 0.1 * jax.random.normal(k_u, (A,), dtype=jnp.float32)
    # torch.nn.functional.gumbel_softmax samples standard Gumbel(0,1) noise
    # internally; sampled here in the wrapper and passed into the kernel.
    gumbel = jax.random.gumbel(k_g, (B, S), dtype=jnp.float32)

    x_out, alphas = channel_sampler(x, w_omega, b_omega, u_omega, gumbel)
    jax.block_until_ready((x_out, alphas))
    assert x_out.shape == (B, H) and alphas.shape == (B, S)

    x_ref, a_ref = channel_sampler_ref(x, w_omega, b_omega, u_omega, gumbel)
    assert jnp.allclose(alphas, a_ref, atol=1e-6)
    assert jnp.allclose(x_out, x_ref, atol=1e-5, rtol=1e-5)


if __name__ == "__main__":
    # Small shapes consistent with the module: batch=2, channels(seq)=8,
    # hidden=32, attention_size=32 (single-step grid path).
    _check(B=2, S=8, H=32, A=32, seed=0)
    # Multi-step, ragged-tail, megacore-eligible path (B not a multiple of TB).
    _check(B=37, S=8, H=32, A=32, seed=0)
    print("KERNEL_OK")
</pallas_src>

<mosaic_0001>
module attributes {stable_mosaic.version = 11 : i64} {
  func.func @channel_sampler_kernel(%arg0: i32, %arg1: memref<2x256xf32, #tpu.memory_space<vmem>>, %arg2: memref<256x256xf32, #tpu.memory_space<vmem>>, %arg3: memref<1x256xf32, #tpu.memory_space<vmem>>, %arg4: memref<256x8xf32, #tpu.memory_space<vmem>>, %arg5: memref<2x8xf32, #tpu.memory_space<vmem>>, %arg6: memref<2x32xf32, #tpu.memory_space<vmem>>, %arg7: memref<2x8xf32, #tpu.memory_space<vmem>>) attributes {dimension_semantics = [#tpu.dimension_semantics<parallel>], iteration_bounds = array<i64: 1>, scalar_prefetch = 0 : i64, scratch_operands = 0 : i64, tpu.core_type = #tpu.core_type<tc>, window_params = [{transform_indices = @transform_0, window_bounds = array<i64: 2, 256>}, {pipeline_mode = #tpu.pipeline_mode<synchronous>, transform_indices = @transform_1, window_bounds = array<i64: 256, 256>}, {pipeline_mode = #tpu.pipeline_mode<synchronous>, transform_indices = @transform_2, window_bounds = array<i64: 1, 256>}, {pipeline_mode = #tpu.pipeline_mode<synchronous>, transform_indices = @transform_3, window_bounds = array<i64: 256, 8>}, {transform_indices = @transform_4, window_bounds = array<i64: 2, 8>}, {transform_indices = @transform_5, window_bounds = array<i64: 2, 32>}, {transform_indices = @transform_6, window_bounds = array<i64: 2, 8>}]} {
    %c0 = arith.constant 0 : index
    %c0_0 = arith.constant 0 : index
    %0 = vector.load %arg1[%c0, %c0_0] : memref<2x256xf32, #tpu.memory_space<vmem>>, vector<2x256xf32>
    %c0_1 = arith.constant 0 : index
    %c0_2 = arith.constant 0 : index
    %1 = vector.load %arg2[%c0_1, %c0_2] : memref<256x256xf32, #tpu.memory_space<vmem>>, vector<256x256xf32>
    %cst = arith.constant dense<0.000000e+00> : vector<2x256xf32>
    %2 = tpu.matmul %0, %1, %cst {dimension_numbers = #tpu.dot_dimension_numbers<[1], [0], [0], [1], [0, 0, 1, 1], [], []>} : vector<2x256xf32>, vector<256x256xf32>, vector<2x256xf32> -> vector<2x256xf32>
    %c0_3 = arith.constant 0 : index
    %c0_4 = arith.constant 0 : index
    %3 = vector.load %arg3[%c0_3, %c0_4] : memref<1x256xf32, #tpu.memory_space<vmem>>, vector<1x256xf32>
    %4 = vector.broadcast %3 : vector<1x256xf32> to vector<2x256xf32>
    %5 = arith.addf %2, %4 : vector<2x256xf32>
    %6 = math.tanh %5 : vector<2x256xf32>
    %c0_5 = arith.constant 0 : index
    %c0_6 = arith.constant 0 : index
    %7 = vector.load %arg4[%c0_5, %c0_6] : memref<256x8xf32, #tpu.memory_space<vmem>>, vector<256x8xf32>
    %cst_7 = arith.constant dense<0.000000e+00> : vector<2x8xf32>
    %8 = tpu.matmul %6, %7, %cst_7 {dimension_numbers = #tpu.dot_dimension_numbers<[1], [0], [0], [1], [0, 0, 1, 1], [], []>} : vector<2x256xf32>, vector<256x8xf32>, vector<2x8xf32> -> vector<2x8xf32>
    %9 = math.exp %8 : vector<2x8xf32>
    %cst_8 = arith.constant dense<0.000000e+00> : vector<2xf32>
    %10 = vector.multi_reduction <add>, %9, %cst_8 [1] : vector<2x8xf32> to vector<2xf32>
    %11 = vector.shape_cast %10 : vector<2xf32> to vector<2x1xf32>
    %12 = vector.broadcast %11 : vector<2x1xf32> to vector<2x8xf32>
    %13 = arith.divf %9, %12 : vector<2x8xf32>
    %c0_9 = arith.constant 0 : index
    %c0_10 = arith.constant 0 : index
    %14 = vector.load %arg5[%c0_9, %c0_10] : memref<2x8xf32, #tpu.memory_space<vmem>>, vector<2x8xf32>
    %15 = arith.addf %13, %14 : vector<2x8xf32>
    %cst_11 = arith.constant dense<0xFF800000> : vector<2xf32>
    %16 = vector.multi_reduction <maximumf>, %15, %cst_11 [1] : vector<2x8xf32> to vector<2xf32>
    %17 = vector.shape_cast %16 : vector<2xf32> to vector<2x1xf32>
    %18 = tpu.iota {dimensions = array<i32: 1>} : vector<2x8xi32>
    %19 = vector.broadcast %17 : vector<2x1xf32> to vector<2x8xf32>
    %20 = arith.cmpf oeq, %15, %19 : vector<2x8xf32>
    %c8_i32 = arith.constant 8 : i32
    %21 = vector.broadcast %c8_i32 : i32 to vector<2x8xi32>
    %22 = arith.select %20, %18, %21 : vector<2x8xi1>, vector<2x8xi32>
    %cst_12 = arith.constant dense<2147483647> : vector<2xi32>
    %23 = vector.multi_reduction <minsi>, %22, %cst_12 [1] : vector<2x8xi32> to vector<2xi32>
    %24 = vector.shape_cast %23 : vector<2xi32> to vector<2x1xi32>
    %25 = vector.broadcast %24 : vector<2x1xi32> to vector<2x8xi32>
    %26 = arith.cmpi eq, %18, %25 : vector<2x8xi32>
    %27 = arith.extui %26 : vector<2x8xi1> to vector<2x8xi32>
    %28 = arith.sitofp %27 : vector<2x8xi32> to vector<2x8xf32>
    %c0_i32 = arith.constant 0 : i32
    %29 = vector.broadcast %c0_i32 : i32 to vector<2x1xi32>
    %30 = arith.cmpi eq, %24, %29 : vector<2x1xi32>
    %31 = vector.extract_strided_slice %0 {offsets = [0, 0], sizes = [2, 32], strides = [1, 1]} : vector<2x256xf32> to vector<2x32xf32>
    %cst_13 = arith.constant 0.000000e+00 : f32
    %32 = vector.shape_cast %30 : vector<2x1xi1> to vector<2x1xi1>
    %33 = vector.broadcast %32 : vector<2x1xi1> to vector<2x32xi1>
    %34 = vector.broadcast %cst_13 : f32 to vector<2x32xf32>
    %35 = arith.select %33, %31, %34 : vector<2x32xi1>, vector<2x32xf32>
    %c1_i32 = arith.constant 1 : i32
    %36 = vector.broadcast %c1_i32 : i32 to vector<2x1xi32>
    %37 = arith.cmpi eq, %24, %36 : vector<2x1xi32>
    %38 = vector.extract_strided_slice %0 {offsets = [0, 32], sizes = [2, 32], strides = [1, 1]} : vector<2x256xf32> to vector<2x32xf32>
    %cst_14 = arith.constant 0.000000e+00 : f32
    %39 = vector.shape_cast %37 : vector<2x1xi1> to vector<2x1xi1>
    %40 = vector.broadcast %39 : vector<2x1xi1> to vector<2x32xi1>
    %41 = vector.broadcast %cst_14 : f32 to vector<2x32xf32>
    %42 = arith.select %40, %38, %41 : vector<2x32xi1>, vector<2x32xf32>
    %43 = arith.addf %35, %42 : vector<2x32xf32>
    %c2_i32 = arith.constant 2 : i32
    %44 = vector.broadcast %c2_i32 : i32 to vector<2x1xi32>
    %45 = arith.cmpi eq, %24, %44 : vector<2x1xi32>
    %46 = vector.extract_strided_slice %0 {offsets = [0, 64], sizes = [2, 32], strides = [1, 1]} : vector<2x256xf32> to vector<2x32xf32>
    %cst_15 = arith.constant 0.000000e+00 : f32
    %47 = vector.shape_cast %45 : vector<2x1xi1> to vector<2x1xi1>
    %48 = vector.broadcast %47 : vector<2x1xi1> to vector<2x32xi1>
    %49 = vector.broadcast %cst_15 : f32 to vector<2x32xf32>
    %50 = arith.select %48, %46, %49 : vector<2x32xi1>, vector<2x32xf32>
    %51 = arith.addf %43, %50 : vector<2x32xf32>
    %c3_i32 = arith.constant 3 : i32
    %52 = vector.broadcast %c3_i32 : i32 to vector<2x1xi32>
    %53 = arith.cmpi eq, %24, %52 : vector<2x1xi32>
    %54 = vector.extract_strided_slice %0 {offsets = [0, 96], sizes = [2, 32], strides = [1, 1]} : vector<2x256xf32> to vector<2x32xf32>
    %cst_16 = arith.constant 0.000000e+00 : f32
    %55 = vector.shape_cast %53 : vector<2x1xi1> to vector<2x1xi1>
    %56 = vector.broadcast %55 : vector<2x1xi1> to vector<2x32xi1>
    %57 = vector.broadcast %cst_16 : f32 to vector<2x32xf32>
    %58 = arith.select %56, %54, %57 : vector<2x32xi1>, vector<2x32xf32>
    %59 = arith.addf %51, %58 : vector<2x32xf32>
    %c4_i32 = arith.constant 4 : i32
    %60 = vector.broadcast %c4_i32 : i32 to vector<2x1xi32>
    %61 = arith.cmpi eq, %24, %60 : vector<2x1xi32>
    %62 = vector.extract_strided_slice %0 {offsets = [0, 128], sizes = [2, 32], strides = [1, 1]} : vector<2x256xf32> to vector<2x32xf32>
    %cst_17 = arith.constant 0.000000e+00 : f32
    %63 = vector.shape_cast %61 : vector<2x1xi1> to vector<2x1xi1>
    %64 = vector.broadcast %63 : vector<2x1xi1> to vector<2x32xi1>
    %65 = vector.broadcast %cst_17 : f32 to vector<2x32xf32>
    %66 = arith.select %64, %62, %65 : vector<2x32xi1>, vector<2x32xf32>
    %67 = arith.addf %59, %66 : vector<2x32xf32>
    %c5_i32 = arith.constant 5 : i32
    %68 = vector.broadcast %c5_i32 : i32 to vector<2x1xi32>
    %69 = arith.cmpi eq, %24, %68 : vector<2x1xi32>
    %70 = vector.extract_strided_slice %0 {offsets = [0, 160], sizes = [2, 32], strides = [1, 1]} : vector<2x256xf32> to vector<2x32xf32>
    %cst_18 = arith.constant 0.000000e+00 : f32
    %71 = vector.shape_cast %69 : vector<2x1xi1> to vector<2x1xi1>
    %72 = vector.broadcast %71 : vector<2x1xi1> to vector<2x32xi1>
    %73 = vector.broadcast %cst_18 : f32 to vector<2x32xf32>
    %74 = arith.select %72, %70, %73 : vector<2x32xi1>, vector<2x32xf32>
    %75 = arith.addf %67, %74 : vector<2x32xf32>
    %c6_i32 = arith.constant 6 : i32
    %76 = vector.broadcast %c6_i32 : i32 to vector<2x1xi32>
    %77 = arith.cmpi eq, %24, %76 : vector<2x1xi32>
    %78 = vector.extract_strided_slice %0 {offsets = [0, 192], sizes = [2, 32], strides = [1, 1]} : vector<2x256xf32> to vector<2x32xf32>
    %cst_19 = arith.constant 0.000000e+00 : f32
    %79 = vector.shape_cast %77 : vector<2x1xi1> to vector<2x1xi1>
    %80 = vector.broadcast %79 : vector<2x1xi1> to vector<2x32xi1>
    %81 = vector.broadcast %cst_19 : f32 to vector<2x32xf32>
    %82 = arith.select %80, %78, %81 : vector<2x32xi1>, vector<2x32xf32>
    %83 = arith.addf %75, %82 : vector<2x32xf32>
    %c7_i32 = arith.constant 7 : i32
    %84 = vector.broadcast %c7_i32 : i32 to vector<2x1xi32>
    %85 = arith.cmpi eq, %24, %84 : vector<2x1xi32>
    %86 = vector.extract_strided_slice %0 {offsets = [0, 224], sizes = [2, 32], strides = [1, 1]} : vector<2x256xf32> to vector<2x32xf32>
    %cst_20 = arith.constant 0.000000e+00 : f32
    %87 = vector.shape_cast %85 : vector<2x1xi1> to vector<2x1xi1>
    %88 = vector.broadcast %87 : vector<2x1xi1> to vector<2x32xi1>
    %89 = vector.broadcast %cst_20 : f32 to vector<2x32xf32>
    %90 = arith.select %88, %86, %89 : vector<2x32xi1>, vector<2x32xf32>
    %91 = arith.addf %83, %90 : vector<2x32xf32>
    %c0_21 = arith.constant 0 : index
    %c0_22 = arith.constant 0 : index
    %92 = vector.load %arg6[%c0_21, %c0_22] : memref<2x32xf32, #tpu.memory_space<vmem>>, vector<2x32xf32>
    tpu.vector_store %arg6[%c0_21, %c0_22], %91 {strides = array<i32>} : memref<2x32xf32, #tpu.memory_space<vmem>>, vector<2x32xf32>,
    %c0_23 = arith.constant 0 : index
    %c0_24 = arith.constant 0 : index
    %93 = vector.load %arg7[%c0_23, %c0_24] : memref<2x8xf32, #tpu.memory_space<vmem>>, vector<2x8xf32>
    tpu.vector_store %arg7[%c0_23, %c0_24], %28 {strides = array<i32>} : memref<2x8xf32, #tpu.memory_space<vmem>>, vector<2x8xf32>,
    return
  }
  func.func @transform_0(%arg0: i32) -> (i32, i32) {
    %c0_i32 = arith.constant 0 : i32
    %c0_i32_0 = arith.constant 0 : i32
    return %arg0, %c0_i32 : i32, i32
  }
  func.func @transform_1(%arg0: i32) -> (i32, i32) {
    %c0_i32 = arith.constant 0 : i32
    %c0_i32_0 = arith.constant 0 : i32
    %c0_i32_1 = arith.constant 0 : i32
    return %c0_i32, %c0_i32_0 : i32, i32
  }
  func.func @transform_2(%arg0: i32) -> (i32, i32) {
    %c0_i32 = arith.constant 0 : i32
    %c0_i32_0 = arith.constant 0 : i32
    %c0_i32_1 = arith.constant 0 : i32
    return %c0_i32, %c0_i32_0 : i32, i32
  }
  func.func @transform_3(%arg0: i32) -> (i32, i32) {
    %c0_i32 = arith.constant 0 : i32
    %c0_i32_0 = arith.constant 0 : i32
    %c0_i32_1 = arith.constant 0 : i32
    return %c0_i32, %c0_i32_0 : i32, i32
  }
  func.func @transform_4(%arg0: i32) -> (i32, i32) {
    %c0_i32 = arith.constant 0 : i32
    %c0_i32_0 = arith.constant 0 : i32
    return %arg0, %c0_i32 : i32, i32
  }
  func.func @transform_5(%arg0: i32) -> (i32, i32) {
    %c0_i32 = arith.constant 0 : i32
    %c0_i32_0 = arith.constant 0 : i32
    return %arg0, %c0_i32 : i32, i32
  }
  func.func @transform_6(%arg0: i32) -> (i32, i32) {
    %c0_i32 = arith.constant 0 : i32
    %c0_i32_0 = arith.constant 0 : i32
    return %arg0, %c0_i32 : i32, i32
  }
}

</mosaic_0001>

<bundles_post_ra>
// kernel: tpu_custom_call.1
= control target key start
LH: loop header
LB: loop body
LE: loop exit
PB: predicated region body
PF: predicated region fallthrough
CT: control target
= control target key end

     0   :  { %12 = vsyncpa [#allocation3], 0  ;;  %s734_s0 = inlined_call_operand.vmem [shape: f32[2,256], index: 0, kind: input, shape index: {}]   ;;  %s735_s1 = inlined_call_operand.hbm [shape: f32[256,256], index: 1, kind: input, shape index: {}]   ;;  %s736_s2 = inlined_call_operand.vmem [shape: f32[1,256], index: 2, kind: input, shape index: {}]   ;;  %s737_s3 = inlined_call_operand.vmem [shape: f32[256,8], index: 3, kind: input, shape index: {}]   ;;  %s738_s4 = inlined_call_operand.vmem [shape: f32[2,8], index: 4, kind: input, shape index: {}]   ;;  %s739_s5 = inlined_call_operand.hbm [shape: f32[2,32], index: 5, kind: output, shape index: {0}]   ;;  %s740_s6 = inlined_call_operand.hbm [shape: f32[2,8], index: 6, kind: output, shape index: {1}]  }
   0x1   :  { %13 = vsyncpa [#allocation4], 0 }
   0x2   :  { %14 = vsyncpa [#allocation7], 0  ;;  %s545_s21 = smov [#allocation2]  }
   0x3   :  { %s22_s22 = sshll.u32 %s545_s21, 4  ;;  %s23_s22 = int_to_ptr.vmem [resolvable:$true] %s22_s22 }
   0x4   :  { %s487_s23 = scalar_lea.vmem %s23_s22, 8192  ;;  %p492_p1 = scmp.lt.s32.totalorder %s23_s22, %s23_s22 }
   0x5   :  { %p488_p0 = scmp.ne.s32.totalorder %s23_s22, %s487_s23  ;;  %p493_p2 = scmp.lt.s32.totalorder %s487_s23, %s487_s23 }
   0x7   :  { %p494_p3 = por %p493_p2, %p492_p1 }
   0x9   :  { %p495_p4 = pnand %p494_p3, %p488_p0 }
   0xb   :  { %498 = shalt.err (!%p495_p4)
}
   0xc   :  { %s546_s24 = smov 256   ;;  %s547_s25 = smov 16  }
   0xd   :  { %28 = dma.hbm_to_vmem [thread:$0]  %s735_s1, 8192, %s23_s22, [#allocation3], %s546_s24, %s546_s24, %s547_s25  }
   0xe   :  { %539 = dma.done.wait [#allocation3], 8192  }
   0xf   :  { %540 = vsyncadd [#allocation3], 4294959104  ;;  %v70_v0 = vld [vmem:[#allocation2 + $0xf8] sm:$0xff]  ;;  %v69_v1 = vld [vmem:[#allocation2 + $0xf0] sm:$0xff]  ;;  %v105_v13 = vlaneseq  ;;  %v548_v14 = vmov 1983009808  }
  0x10   :  { %v68_v2 = vld [vmem:[#allocation2 + $0xe8] sm:$0xff]  ;;  %126 = vmatprep.subr.mxu0 %v70_v0  ;;  %v67_v3 = vld [vmem:[#allocation2 + $0xe0] sm:$0xff]  ;;  %v66_v4 = vld [vmem:[#allocation2 + $0xd8] sm:$0xff]  ;;  %v117_v15 = vunpack.c.l.s4 %v548_v14  ;;  %vm303_vm0 = vcmask 58368   ;;  %s549_s18 = smov 96   ;;  %s550_s19 = smov 64  }
  0x11   :  { %127 = vmatpush1.msra.mxu0 %v69_v1  ;;  %v65_v5 = vld [vmem:[#allocation2 + $0xd0] sm:$0xff]  ;;  %v64_v6 = vld [vmem:[#allocation2 + $0xc8] sm:$0xff]  ;;  %v63_v7 = vld [vmem:[#allocation2 + $0xc0] sm:$0xff]  ;;  %v594_v20 = vshrl.u32 %v105_v13, 7  ;;  %s552_s20 = smov [#allocation6]  }
  0x12   :  { %128 = vmatprep.subr.mxu0 %v68_v2  ;;  %v62_v8 = vld [vmem:[#allocation2 + $0xb8] sm:$0xff]  ;;  %v61_v9 = vld [vmem:[#allocation2 + $0xb0] sm:$0xff]  ;;  %v60_v10 = vld [vmem:[#allocation2 + $0xa8] sm:$0xff]  ;;  %v118_v21 = vunpack.c.0.s8 %v117_v15  ;;  %s412_s21 = sshll.u32 %s552_s20, 4  ;;  %s413_s21 = int_to_ptr.vmem [resolvable:$true] %s412_s21 }
  0x13   :  { %129 = vmatpush1.msra.mxu0 %v67_v3  ;;  %v59_v11 = vld [vmem:[#allocation2 + $0xa0] sm:$0xff]  ;;  %v58_v12 = vld [vmem:[#allocation2 + $0x98] sm:$0xff]  ;;  %v57_v16 = vld [vmem:[#allocation2 + $0x90] sm:$0xff]  ;;  %s499_s22 = scalar_lea.vmem %s413_s21, 32  ;;  %p504_p6 = scmp.lt.s32.totalorder %s413_s21, %s413_s21 }
  0x14   :  { %130 = vmatprep.subr.mxu0 %v66_v4  ;;  %v56_v17 = vld [vmem:[#allocation2 + $0x88] sm:$0xff]  ;;  %v55_v18 = vld [vmem:[#allocation2 + $0x80] sm:$0xff]  ;;  %v54_v19 = vld [vmem:[#allocation2 + $0x78] sm:$0xff]  ;;  %v121_v26 = vsub.s32 %v118_v21, %v594_v20  ;;  %p500_p5 = scmp.ne.s32.totalorder %s413_s21, %s499_s22  ;;  %p505_p7 = scmp.lt.s32.totalorder %s499_s22, %s499_s22 }
  0x15   :  { %131 = vmatpush1.msra.mxu0 %v65_v5  ;;  %v53_v22 = vld [vmem:[#allocation2 + $0x70] sm:$0xff]  ;;  %v52_v23 = vld [vmem:[#allocation2 + $0x68] sm:$0xff]  ;;  %v51_v24 = vld [vmem:[#allocation2 + $0x60] sm:$0xff] }
  0x16   :  { %132 = vmatprep.subr.mxu0 %v64_v6  ;;  %v50_v25 = vld [vmem:[#allocation2 + $0x58] sm:$0xff]  ;;  %v49_v27 = vld [vmem:[#allocation2 + $0x50] sm:$0xff]  ;;  %v48_v28 = vld [vmem:[#allocation2 + $0x48] sm:$0xff]  ;;  %p506_p8 = por %p505_p7, %p504_p6 }
  0x17   :  { %133 = vmatpush1.msra.mxu0 %v63_v7  ;;  %v47_v29 = vld [vmem:[#allocation2 + $0x40] sm:$0xff]  ;;  %v46_v30 = vld [vmem:[#allocation2 + $0x38] sm:$0xff]  ;;  %v229_v35 = vld [vmem:[%s737_s3 + $0xf0] sm:$0xff] }
  0x18   :  { %134 = vmatprep.subr.mxu0 %v62_v8  ;;  %v600_v31 = vld [vmem:[%s734_s0] sm:$0xf]  ;;  %v230_v32 = vld [vmem:[%s737_s3 + $0xf8] sm:$0xff]  ;;  %v213_v36 = vld [vmem:[%s737_s3 + $0x70] sm:$0xff]  ;;  %p507_p9 = pnand %p506_p8, %p500_p5 }
  0x19   :  { %135 = vmatpush1.msra.mxu0 %v61_v9  ;;  %v606_v33 = vrot.slane %v600_v31, %v121_v26  ;;  %426 = vmatprep.subr.mxu1 %v230_v32  ;;  %v214_v34 = vld [vmem:[%s737_s3 + $0x78] sm:$0xff]  ;;  %v45_v37 = vld [vmem:[#allocation2 + $0x30] sm:$0xff]  ;;  %v44_v38 = vld [vmem:[#allocation2 + $0x28] sm:$0xff] }
  0x1a   :  { %136 = vmatprep.subr.mxu0 %v60_v10  ;;  %427 = vmatpush3.msra.mxu1 %v214_v34  ;;  %v228_v40 = vld [vmem:[%s737_s3 + $0xe8] sm:$0xff]  ;;  %v43_v41 = vld [vmem:[#allocation2 + $0x20] sm:$0xff]  ;;  %v42_v43 = vld [vmem:[#allocation2 + $0x18] sm:$0xff] }
  0x1b   :  { %137 = vmatpush1.msra.mxu0 %v59_v11  ;;  %v619_v39 = vcombine.high %v606_v33, %v606_v33  ;;  %428 = vmatprep.subr.mxu1 %v229_v35  ;;  %v212_v42 = vld [vmem:[%s737_s3 + $0x68] sm:$0xff]  ;;  %v227_v44 = vld [vmem:[%s737_s3 + $0xe0] sm:$0xff]  ;;  %v41_v45 = vld [vmem:[#allocation2 + $0x10] sm:$0xff] }
  0x1c   :  { %138 = vmatprep.subr.mxu0 %v58_v12  ;;  %429 = vmatpush3.msra.mxu1 %v213_v36  ;;  %v211_v46 = vld [vmem:[%s737_s3 + $0x60] sm:$0xff]  ;;  %v40_v47 = vld [vmem:[#allocation2 + $0x8] sm:$0xff]  ;;  %v226_v48 = vld [vmem:[%s737_s3 + $0xd8] sm:$0xff] }
  0x1d   :  { %139 = vmatpush1.msra.mxu0 %v57_v16  ;;  %190 = vmatprep.mubr.f32.mxu0 %v619_v39  ;;  %v39_v49 = vld [vmem:[#allocation2] sm:$0xff]  ;;  %v210_v50 = vld [vmem:[%s737_s3 + $0x58] sm:$0xff]  ;;  %v225_v52 = vld [vmem:[%s737_s3 + $0xd0] sm:$0xff] }
  0x1e   :  { %140 = vmatprep.subr.mxu0 %v56_v17  ;;  %430 = vmatprep.subr.mxu1 %v228_v40  ;;  %v102_v51 = vld [vmem:[#allocation2 + $0x1f8] sm:$0xff]  ;;  %v101_v53 = vld [vmem:[#allocation2 + $0x1f0] sm:$0xff]  ;;  %v100_v55 = vld [vmem:[#allocation2 + $0x1e8] sm:$0xff] }
  0x1f   :  { %141 = vmatpush1.msra.mxu0 %v55_v18  ;;  %431 = vmatpush3.msra.mxu1 %v212_v42  ;;  %v209_v54 = vld [vmem:[%s737_s3 + $0x50] sm:$0xff]  ;;  %v99_v56 = vld [vmem:[#allocation2 + $0x1e0] sm:$0xff]  ;;  %v98_v57 = vld [vmem:[#allocation2 + $0x1d8] sm:$0xff] }
  0x20   :  { %142 = vmatprep.subr.mxu0 %v54_v19  ;;  %432 = vmatprep.subr.mxu1 %v227_v44  ;;  %v97_v58 = vld [vmem:[#allocation2 + $0x1d0] sm:$0xff]  ;;  %v96_v59 = vld [vmem:[#allocation2 + $0x1c8] sm:$0xff]  ;;  %v95_v60 = vld [vmem:[#allocation2 + $0x1c0] sm:$0xff] }
  0x21   :  { %143 = vmatpush1.msra.mxu0 %v53_v22  ;;  %433 = vmatpush3.msra.mxu1 %v211_v46  ;;  %v94_v61 = vld [vmem:[#allocation2 + $0x1b8] sm:$0xff]  ;;  %v93_v62 = vld [vmem:[#allocation2 + $0x1b0] sm:$0xff]  ;;  %v92_v63 = vld [vmem:[#allocation2 + $0x1a8] sm:$0xff]  ;;  %v107_v46 = vsub.s32 0, %v594_v20 }
  0x22   :  { %144 = vmatprep.subr.mxu0 %v52_v23  ;;  %434 = vmatprep.subr.mxu1 %v226_v48  ;;  %v91_v0 = vld [vmem:[#allocation2 + $0x1a0] sm:$0xff]  ;;  %v90_v1 = vld [vmem:[#allocation2 + $0x198] sm:$0xff]  ;;  %v89_v2 = vld [vmem:[#allocation2 + $0x190] sm:$0xff]  ;;  %v111_v48 = vsub.s32 1, %v594_v20 }
  0x23   :  { %145 = vmatpush1.msra.mxu0 %v51_v24  ;;  %435 = vmatpush3.msra.mxu1 %v210_v50  ;;  %v88_v3 = vld [vmem:[#allocation2 + $0x188] sm:$0xff]  ;;  %v87_v4 = vld [vmem:[#allocation2 + $0x180] sm:$0xff]  ;;  %v86_v5 = vld [vmem:[#allocation2 + $0x178] sm:$0xff] }
  0x24   :  { %146 = vmatprep.subr.mxu0 %v50_v25  ;;  %436 = vmatprep.subr.mxu1 %v225_v52  ;;  %v85_v6 = vld [vmem:[#allocation2 + $0x170] sm:$0xff]  ;;  %v84_v7 = vld [vmem:[#allocation2 + $0x168] sm:$0xff]  ;;  %v83_v8 = vld [vmem:[#allocation2 + $0x160] sm:$0xff] }
  0x25   :  { %147 = vmatpush1.msra.mxu0 %v49_v27  ;;  %437 = vmatpush3.msra.mxu1 %v209_v54  ;;  %v82_v9 = vld [vmem:[#allocation2 + $0x158] sm:$0xff]  ;;  %v81_v10 = vld [vmem:[#allocation2 + $0x150] sm:$0xff]  ;;  %v80_v11 = vld [vmem:[#allocation2 + $0x148] sm:$0xff] }
  0x26   :  { %148 = vmatprep.subr.mxu0 %v48_v28  ;;  %v79_v12 = vld [vmem:[#allocation2 + $0x140] sm:$0xff]  ;;  %v78_v14 = vld [vmem:[#allocation2 + $0x138] sm:$0xff]  ;;  %v77_v15 = vld [vmem:[#allocation2 + $0x130] sm:$0xff] }
  0x27   :  { %149 = vmatpush1.msra.mxu0 %v47_v29  ;;  %v76_v16 = vld [vmem:[#allocation2 + $0x128] sm:$0xff]  ;;  %v75_v17 = vld [vmem:[#allocation2 + $0x120] sm:$0xff]  ;;  %v74_v18 = vld [vmem:[#allocation2 + $0x118] sm:$0xff] }
  0x28   :  { %150 = vmatprep.subr.mxu0 %v46_v30  ;;  %v73_v19 = vld [vmem:[#allocation2 + $0x110] sm:$0xff]  ;;  %v72_v21 = vld [vmem:[#allocation2 + $0x108] sm:$0xff]  ;;  %v71_v22 = vld [vmem:[#allocation2 + $0x100] sm:$0xff] }
  0x29   :  { %151 = vmatpush1.msra.mxu0 %v45_v37  ;;  %v224_v23 = vld [vmem:[%s737_s3 + $0xc8] sm:$0xff]  ;;  %v223_v25 = vld [vmem:[%s737_s3 + $0xc0] sm:$0xff]  ;;  %v222_v27 = vld [vmem:[%s737_s3 + $0xb8] sm:$0xff] }
  0x2a   :  { %152 = vmatprep.subr.mxu0 %v44_v38  ;;  %438 = vmatprep.subr.mxu1 %v224_v23  ;;  %v208_v24 = vld [vmem:[%s737_s3 + $0x48] sm:$0xff]  ;;  %v207_v26 = vld [vmem:[%s737_s3 + $0x40] sm:$0xff]  ;;  %v206_v28 = vld [vmem:[%s737_s3 + $0x38] sm:$0xff] }
  0x2b   :  { %153 = vmatpush1.msra.mxu0 %v43_v41  ;;  %439 = vmatpush3.msra.mxu1 %v208_v24  ;;  %v221_v29 = vld [vmem:[%s737_s3 + $0xb0] sm:$0xff]  ;;  %v220_v32 = vld [vmem:[%s737_s3 + $0xa8] sm:$0xff]  ;;  %v219_v35 = vld [vmem:[%s737_s3 + $0xa0] sm:$0xff] }
  0x2c   :  { %154 = vmatprep.subr.mxu0 %v42_v43  ;;  %440 = vmatprep.subr.mxu1 %v223_v25  ;;  %v205_v30 = vld [vmem:[%s737_s3 + $0x30] sm:$0xff]  ;;  %v204_v34 = vld [vmem:[%s737_s3 + $0x28] sm:$0xff]  ;;  %v203_v36 = vld [vmem:[%s737_s3 + $0x20] sm:$0xff] }
  0x2d   :  { %155 = vmatpush1.msra.mxu0 %v41_v45  ;;  %441 = vmatpush3.msra.mxu1 %v207_v26  ;;  %v218_v37 = vld [vmem:[%s737_s3 + $0x98] sm:$0xff]  ;;  %v217_v40 = vld [vmem:[%s737_s3 + $0x90] sm:$0xff]  ;;  %v216_v42 = vld [vmem:[%s737_s3 + $0x88] sm:$0xff] }
  0x2e   :  { %156 = vmatprep.subr.mxu0 %v40_v47  ;;  %442 = vmatprep.subr.mxu1 %v222_v27  ;;  %v202_v38 = vld [vmem:[%s737_s3 + $0x18] sm:$0xff]  ;;  %v201_v41 = vld [vmem:[%s737_s3 + $0x10] sm:$0xff]  ;;  %v200_v43 = vld [vmem:[%s737_s3 + $0x8] sm:$0xff] }
  0x2f   :  { %157 = vmatpush1.msra.mxu0 %v39_v49  ;;  %443 = vmatpush3.msra.mxu1 %v206_v28  ;;  %v215_v44 = vld [vmem:[%s737_s3 + $0x80] sm:$0xff] }
  0x30   :  { %158 = vmatprep.subr.mxu0 %v102_v51  ;;  %444 = vmatprep.subr.mxu1 %v221_v29  ;;  %v199_v45 = vld [vmem:[%s737_s3] sm:$0xff]  ;;  %v553_v29 = vmov 0.0  }
  0x31   :  { %159 = vmatpush2.msra.mxu0 %v101_v53  ;;  %445 = vmatpush3.msra.mxu1 %v205_v30  ;;  %v103_v47 = vld [vmem:[%s736_s2] sm:$0x3] }
  0x32   :  { %160 = vmatprep.subr.mxu0 %v100_v55  ;;  %446 = vmatprep.subr.mxu1 %v220_v32  ;;  %v108_v49 = vrot.slane %v103_v47, %v107_v46  ;;  %v112_v50 = vrot.slane %v103_v47, %v111_v48 }
  0x33   :  { %161 = vmatpush2.msra.mxu0 %v99_v56  ;;  %447 = vmatpush3.msra.mxu1 %v204_v34 }
  0x34   :  { %162 = vmatprep.subr.mxu0 %v98_v57  ;;  %448 = vmatprep.subr.mxu1 %v219_v35 }
  0x35   :  { %163 = vmatpush2.msra.mxu0 %v97_v58  ;;  %449 = vmatpush3.msra.mxu1 %v203_v36 }
  0x36   :  { %164 = vmatprep.subr.mxu0 %v96_v59  ;;  %450 = vmatprep.subr.mxu1 %v218_v37 }
  0x37   :  { %165 = vmatpush2.msra.mxu0 %v95_v60  ;;  %451 = vmatpush3.msra.mxu1 %v202_v38 }
  0x38   :  { %166 = vmatprep.subr.mxu0 %v94_v61  ;;  %452 = vmatprep.subr.mxu1 %v217_v40 }
  0x39   :  { %167 = vmatpush2.msra.mxu0 %v93_v62  ;;  %453 = vmatpush3.msra.mxu1 %v201_v41 }
  0x3a   :  { %168 = vmatprep.subr.mxu0 %v92_v63  ;;  %454 = vmatprep.subr.mxu1 %v216_v42 }
  0x3b   :  { %169 = vmatpush2.msra.mxu0 %v91_v0  ;;  %455 = vmatpush3.msra.mxu1 %v200_v43  ;;  %v309_v0 = vld [vmem:[%s738_s4] sm:$0x3]  ;;  %s551_s4 = smov 32  }
  0x3c   :  { %170 = vmatprep.subr.mxu0 %v90_v1  ;;  %456 = vmatprep.subr.mxu1 %v215_v44 }
  0x3d   :  { %171 = vmatpush2.msra.mxu0 %v89_v2  ;;  %457 = vmatpush3.msra.mxu1 %v199_v45 }
  0x3e   :  { %172 = vmatprep.subr.mxu0 %v88_v3 }
  0x3f   :  { %173 = vmatpush2.msra.mxu0 %v87_v4  ;;  %v315_v4 = vand.u32 127, %v105_v13 }
  0x40   :  { %174 = vmatprep.subr.mxu0 %v86_v5 }
  0x41   :  { %175 = vmatpush2.msra.mxu0 %v85_v6 }
  0x42   :  { %176 = vmatprep.subr.mxu0 %v84_v7 }
  0x43   :  { %177 = vmatpush2.msra.mxu0 %v83_v8 }
  0x44   :  { %178 = vmatprep.subr.mxu0 %v82_v9 }
  0x45   :  { %179 = vmatpush2.msra.mxu0 %v81_v10 }
  0x46   :  { %180 = vmatprep.subr.mxu0 %v80_v11 }
  0x47   :  { %181 = vmatpush2.msra.mxu0 %v79_v12 }
  0x48   :  { %182 = vmatprep.subr.mxu0 %v78_v14 }
  0x49   :  { %183 = vmatpush2.msra.mxu0 %v77_v15 }
  0x4a   :  { %184 = vmatprep.subr.mxu0 %v76_v16 }
  0x4b   :  { %185 = vmatpush2.msra.mxu0 %v75_v17 }
  0x4c   :  { %186 = vmatprep.subr.mxu0 %v74_v18 }
  0x4d   :  { %187 = vmatpush2.msra.mxu0 %v73_v19 }
  0x4e   :  { %188 = vmatprep.subr.mxu0 %v72_v21 }
  0x4f   :  { %189 = vmatpush2.msra.mxu0 %v71_v22 }
  0x50   :  { %191 = vmatmul.mubr.f32.vlgmr.msra.gmra.mxu0 %v606_v33 }
 0x110   :  { %v192_v51 = vpop.f32.mrf.mxu0 }
 0x111   :  { %v193_v52 = vadd.f32 %v192_v51, %v108_v49 }
 0x112   :  { %v194_v53 = vpop.f32.mrf.mxu0 }
 0x113   :  { %v195_v54 = vadd.f32 %v194_v53, %v112_v50 }
 0x115   :  { %471 = vtanh.f32 %v195_v54 }
 0x116   :  { %473 = vtanh.f32 %v193_v52 }
 0x122   :  { %v472_v55 = vpop.eup %471 }
 0x123   :  { %v474_v56 = vpop.eup %473  ;;  %295 = vmatprep.mubr.f32.mxu1 %v472_v55 }
 0x124   :  { %296 = vmatmul.mubr.f32.vlgmr.msra.gmra.mxu1 %v474_v56 }
 0x1e4   :  { %v458_v57 = vpop.f32.mrf.mxu1 }
 0x1e6   :  { %v459_v58 = vpop.f32.mrf.mxu1 }
 0x1e7   :  { %v460_v59 = vadd.f32 %v459_v58, %v458_v57 }
 0x1e9   :  { %v301_v60 = vmul.f32 1.442695, %v460_v59 }
 0x1eb   :  { %475 = vpow2.f32 %v301_v60 }
 0x1f8   :  { %v476_v61 = vpop.eup %475 }
 0x1f9   :  { %v304_v20 = vsel %vm303_vm0, %v476_v61, 0.0 }
 0x1fa   :  { %305 = vadd.xlane.f32.xlu0 %v304_v20 }
 0x283   :  { %v306_v62 = vpop.xlane.xlu0 %305 }
 0x284   :  { %477 = vrcp.f32 %v306_v62 }
 0x291   :  { %v478_v63 = vpop.eup %477 }
 0x292   :  { %v308_v1 = vmul.f32 %v478_v63, %v476_v61 }
 0x294   :  { %v310_v2 = vadd.f32 %v309_v0, %v308_v1 }
 0x296   :  { %v311_v3 = vsel %vm303_vm0, %v310_v2, -inf }
 0x297   :  { %312 = vmax.xlane.f32.xlu0 %v311_v3 }
 0x2ad   :  { %343 = vrot.lane.b32.xlu0 %v606_v33, %s549_s18 }
 0x2b1   :  { %380 = vrot.lane.b32.xlu0 %v619_v39, %s550_s19 }
 0x320   :  { %v313_v5 = vpop.xlane.xlu0 %312 }
 0x321   :  { %vm316_vm1 = vcmp.eq.f32.partialorder %v310_v2, %v313_v5 }
 0x322   :  { %v317_v6 = vsel %vm316_vm1, %v315_v4, 8 }
 0x323   :  { %v318_v7 = vsel %vm303_vm0, %v317_v6, 2147483647 }
 0x324   :  { %v320_v8 = vshra.s32 %v318_v7, 16  ;;  %v319_v10 = vand.u32 65535, %v318_v7 }
 0x326   :  { %v322_v9 = vcvt.s32.f32 %v320_v8  ;;  %v321_v12 = vcvt.s32.f32 %v319_v10 }
 0x328   :  { %323 = vmin.xlane.f32.xlu1 %v322_v9 }
 0x339   :  { %351 = vrot.lane.b32.xlu1 %v606_v33, %s550_s19 }
 0x33d   :  { %359 = vrot.lane.b32.xlu1 %v606_v33, %s551_s4  ;;  %v344_v33 = vpop.permute.xlu0 %343 }
 0x341   :  { %372 = vrot.lane.b32.xlu1 %v619_v39, %s549_s18 }
 0x3b1   :  { %v324_v11 = vpop.xlane.xlu1 %323 }
 0x3b2   :  { %vm325_vm2 = vcmp.eq.f32.partialorder %v322_v9, %v324_v11  ;;  %v330_v17 = vcvt.f32.s32 %v324_v11 }
 0x3b3   :  { %v326_v13 = vsel %vm325_vm2, %v321_v12, inf }
 0x3b4   :  { %327 = vmin.xlane.f32.xlu1 %v326_v13  ;;  %v331_v19 = vshll.u32 %v330_v17, 16 }
 0x3b5   :  { %v352_v14 = vpop.permute.xlu1 %351 }
 0x3b9   :  { %v360_v15 = vpop.permute.xlu1 %359 }
 0x3bd   :  { %v373_v16 = vpop.permute.xlu1 %372 }
 0x3c5   :  { %388 = vrot.lane.b32.xlu1 %v619_v39, %s551_s4 }
 0x43d   :  { %v328_v18 = vpop.xlane.xlu1 %327 }
 0x43e   :  { %v329_v21 = vcvt.f32.s32 %v328_v18 }
 0x440   :  { %v332_v22 = vadd.s32 %v331_v19, %v329_v21 }
 0x442   :  { %vm336_vm3 = vcmp.eq.s32.totalorder %v332_v22, 0  ;;  %vm340_vm4 = vcmp.eq.s32.totalorder %v332_v22, 1  ;;  %vm348_vm5 = vcmp.eq.s32.totalorder %v332_v22, 2  ;;  %vm356_vm6 = vcmp.eq.s32.totalorder %v332_v22, 3 }
 0x443   :  { %v339_v23 = vsel %vm336_vm3, %v600_v31, 0.0  ;;  %v346_v24 = vsel %vm340_vm4, %v344_v33, 0.0  ;;  %v354_v26 = vsel %vm348_vm5, %v352_v14, 0.0  ;;  %vm364_vm7 = vcmp.eq.s32.totalorder %v332_v22, 4 }
 0x444   :  { %v347_v25 = vadd.f32 %v346_v24, %v339_v23  ;;  %vm333_vm8 = vcmp.eq.s32.totalorder %v315_v4, %v332_v22  ;;  %v362_v28 = vsel %vm356_vm6, %v360_v15, 0.0  ;;  %vm369_vm9 = vcmp.eq.s32.totalorder %v332_v22, 5 }
 0x445   :  { %v425_v30 = vsel %vm333_vm8, 1.0, %v553_v29  ;;  %v367_v34 = vsel %vm364_vm7, %v619_v39, 0.0 }
 0x446   :  { %v355_v27 = vadd.f32 %v354_v26, %v347_v25  ;;  %395 = vst.msk [vmem:[#allocation6] sm:$0x3] %vm303_vm0, %v425_v30 }
 0x448   :  { %v363_v32 = vadd.f32 %v362_v28, %v355_v27 }
 0x449   :  { %510 = shalt.err (!%p507_p9)
}
 0x44a   :  { %415 = dma.vmem_to_hbm [thread:$0]  %s413_s21, 32, %s740_s6, [#allocation7]   ;;  %v368_v31 = vadd.f32 %v367_v34, %v363_v32  ;;  %vm377_vm10 = vcmp.eq.s32.totalorder %v332_v22, 6  ;;  %v381_v35 = vpop.permute.xlu0 %380  ;;  %v375_v36 = vsel %vm369_vm9, %v373_v16, 0.0  ;;  %vm385_vm11 = vcmp.eq.s32.totalorder %v332_v22, 7  ;;  %v389_v37 = vpop.permute.xlu1 %388 }
 0x44b   :  { %v383_v40 = vsel %vm377_vm10, %v381_v35, 0.0  ;;  %s554_s25 = smov [#allocation5]   ;;  %v391_v41 = vsel %vm385_vm11, %v389_v37, 0.0  ;;  %vm393_vm12 = vcmask 254976  }
 0x44c   :  { %v376_v38 = vadd.f32 %v375_v36, %v368_v31  ;;  %s402_s26 = sshll.u32 %s554_s25, 4  ;;  %s403_s26 = int_to_ptr.vmem [resolvable:$true] %s402_s26 }
 0x44d   :  { %s519_s27 = scalar_lea.vmem %s403_s26, 32  ;;  %p524_p11 = scmp.lt.s32.totalorder %s403_s26, %s403_s26 }
 0x44e   :  { %v384_v39 = vadd.f32 %v383_v40, %v376_v38  ;;  %p520_p10 = scmp.ne.s32.totalorder %s403_s26, %s519_s27  ;;  %p525_p12 = scmp.lt.s32.totalorder %s519_s27, %s519_s27 }
 0x450   :  { %v392_v42 = vadd.f32 %v391_v41, %v384_v39  ;;  %p526_p13 = por %p525_p12, %p524_p11 }
 0x452   :  { %394 = vst.msk [vmem:[#allocation5] sm:$0x3] %vm393_vm12, %v392_v42  ;;  %p527_p0 = pnand %p526_p13, %p520_p10 }
 0x454   :  { %530 = shalt.err (!%p527_p0)
}
 0x455   :  { %405 = dma.vmem_to_hbm [thread:$0]  %s403_s26, 32, %s739_s5, [#allocation4]  }
 0x456   :  { %541 = dma.done.wait [#allocation4], 32  }
 0x457   :  { %542 = vsyncadd [#allocation4], 4294967264 }
 0x458   :  { %543 = dma.done.wait [#allocation7], 32  }
 0x459   :  { %544 = vsyncadd [#allocation7], 4294967264 }
 0x45a   :  { %422 = vsyncpa [#allocation3], 1 }
 0x45b   :  { %423 = vsyncpa [#allocation4], 1 }
 0x45c   :  { %424 = vsyncpa [#allocation7], 1 }

</bundles_post_ra>
